<compile_context>
chip_gen: v5e
topology: v5e:2x2
jax: 0.10.0
libtpu: 0.0.40
codegen_flags: <defaults>
</compile_context>

<pallas_src>
import jax
import jax.numpy as jnp
from jax.experimental import pallas as pl
from jax.experimental.pallas import tpu as pltpu


# ---------------- fused Pallas kernel (whole forward pass) ----------------

def _gcn_fused_kernel(x_ref, adj_ref, dice_ref, wgc_ref, bgc_ref,
                      w1g_ref, w1d_ref, b1_ref, w2_ref, b2_ref, o_ref):
    """One batch element per grid step:
       softmax(W2 @ relu(W1 @ cat(flat(relu(adj@(x@Wgc)+bgc)), dice) + b1) + b2)
    """
    x = x_ref[0]          # (nnode, nfeat)
    adj = adj_ref[0]      # (nnode, nnode)
    dice = dice_ref[0]    # (1, 6)

    # GraphConvolution (Kipf):  relu(adj @ (x @ W) + b)
    support = jnp.dot(x, wgc_ref[...], preferred_element_type=jnp.float32)
    gc = jnp.dot(adj, support, preferred_element_type=jnp.float32) + bgc_ref[...]
    gc = jnp.maximum(gc, 0.0)                                   # (nnode, h)

    # flatten(gc) @ W1[:nnode*h]  folded as  sum_n gc[n] @ W1_3d[n]
    # (W1 reshaped host-side; avoids an in-kernel (nnode,h)->(1,nnode*h) reshape)
    h1 = jnp.dot(dice, w1d_ref[...], preferred_element_type=jnp.float32)  # (1, hid)
    nnode = x_ref.shape[1]
    for n in range(nnode):                       # static, fully unrolled (nnode tiny)
        h1 = h1 + jnp.dot(gc[n:n + 1, :], w1g_ref[n],
                          preferred_element_type=jnp.float32)
    h1 = jnp.maximum(h1 + b1_ref[...], 0.0)

    # TODO(synk): F.dropout(p=0.5) is identity in eval mode; a training-mode mask
    # would use pltpu.prng_seed / prng_random_bits inside this kernel.

    logits = jnp.dot(h1, w2_ref[...], preferred_element_type=jnp.float32) + b2_ref[...]
    m = jnp.max(logits, axis=-1, keepdims=True)
    e = jnp.exp(logits - m)
    inv = pl.reciprocal(jnp.sum(e, axis=-1, keepdims=True), approx=True)  # EUP slot
    o_ref[0] = e * inv


# ---------------- wrappers ----------------

def gcn_forward_batched(x, adj, dice_hot, params):
    """x: (B, nnode, nfeat), adj: (B, nnode, nnode), dice_hot: (B, 6) -> (B, nclass)"""
    B, nnode, nfeat = x.shape
    h = params["w_gc"].shape[1]
    hid = params["w1"].shape[1]
    nclass = params["w2"].shape[1]

    # Fold torch.flatten + torch.cat into the ln1 weight (host-side, free transform).
    w1_gc = params["w1"][: nnode * h].reshape(nnode, h, hid)   # (nnode, h, hid)
    w1_dice = params["w1"][nnode * h:]                          # (6, hid)

    dice3 = dice_hot.astype(jnp.float32).reshape(B, 1, 6)

    probs = pl.pallas_call(
        _gcn_fused_kernel,
        out_shape=jax.ShapeDtypeStruct((B, 1, nclass), jnp.float32),
        grid=(B,),
        in_specs=[
            pl.BlockSpec((1, nnode, nfeat), lambda b: (b, 0, 0)),   # x
            pl.BlockSpec((1, nnode, nnode), lambda b: (b, 0, 0)),   # adj
            pl.BlockSpec((1, 1, 6), lambda b: (b, 0, 0)),           # dice
            pl.BlockSpec((nfeat, h), lambda b: (0, 0)),             # w_gc
            pl.BlockSpec((1, h), lambda b: (0, 0)),                 # b_gc
            pl.BlockSpec((nnode, h, hid), lambda b: (0, 0, 0)),     # w1 (gc part, 3D)
            pl.BlockSpec((6, hid), lambda b: (0, 0)),               # w1 (dice part)
            pl.BlockSpec((1, hid), lambda b: (0, 0)),               # b1
            pl.BlockSpec((hid, nclass), lambda b: (0, 0)),          # w2
            pl.BlockSpec((1, nclass), lambda b: (0, 0)),            # b2
        ],
        out_specs=pl.BlockSpec((1, 1, nclass), lambda b: (b, 0, 0)),
        compiler_params=pltpu.CompilerParams(
            dimension_semantics=("parallel",)),   # batch axis -> 2 TCs on v7x
    )(x, adj, dice3, params["w_gc"], params["b_gc"], w1_gc, w1_dice,
      params["b1"], params["w2"], params["b2"])

    return probs.reshape(B, nclass)


def gcn_forward(x, adj, dice_hot, params):
    """Single-sample path matching the torch forward signature; returns (nclass,)."""
    return gcn_forward_batched(x[None], adj[None], dice_hot[None], params)[0]


# ---------------- pure-JAX reference (for correctness check) ----------------

def gcn_reference(x, adj, dice_hot, params):
    hi = jax.lax.Precision.HIGHEST
    gc = jnp.maximum(
        jnp.dot(adj, jnp.dot(x, params["w_gc"], precision=hi), precision=hi)
        + params["b_gc"], 0.0)
    xcat = jnp.concatenate([gc.reshape(-1), dice_hot.astype(jnp.float32)])
    h1 = jnp.maximum(jnp.dot(xcat, params["w1"], precision=hi) + params["b1"][0], 0.0)
    logits = jnp.dot(h1, params["w2"], precision=hi) + params["b2"][0]
    return jax.nn.softmax(logits)


# ---------------- deterministic parameter init ----------------

def init_params(nnode, nfeat, nclass, h=6, hid=30):
    key = jax.random.PRNGKey(42)
    ks = jax.random.split(key, 6)
    d_in = nnode * h + 6
    # Linear weights stored pre-transposed as (in, out) so the kernel does x @ W.
    return {
        "w_gc": jax.random.uniform(ks[0], (nfeat, h), jnp.float32, -0.4, 0.4),
        "b_gc": jax.random.uniform(ks[1], (1, h), jnp.float32, -0.4, 0.4),
        "w1": jax.random.uniform(ks[2], (d_in, hid), jnp.float32, -0.15, 0.15),
        "b1": jax.random.uniform(ks[3], (1, hid), jnp.float32, -0.15, 0.15),
        "w2": jax.random.uniform(ks[4], (hid, nclass), jnp.float32, -0.18, 0.18),
        "b2": jax.random.uniform(ks[5], (1, nclass), jnp.float32, -0.18, 0.18),
    }


if __name__ == "__main__":
    nnode, nfeat, nclass, B = 8, 8, 4, 4

    key = jax.random.PRNGKey(0)
    kx, ka, kd = jax.random.split(key, 3)

    x = jax.random.normal(kx, (B, nnode, nfeat), jnp.float32)
    # symmetric, self-looped, row-normalized adjacency per batch element
    a = (jax.random.uniform(ka, (B, nnode, nnode)) > 0.6).astype(jnp.float32)
    a = jnp.clip(a + jnp.swapaxes(a, -1, -2) + jnp.eye(nnode, dtype=jnp.float32)[None],
                 0.0, 1.0)
    adj = a / jnp.sum(a, axis=-1, keepdims=True)
    dice_hot = jax.nn.one_hot(jax.random.randint(kd, (B,), 0, 6), 6, dtype=jnp.float32)

    params = init_params(nnode, nfeat, nclass)

    # batched path: one fused kernel launch, batch axis "parallel"
    probs_b = jax.block_until_ready(gcn_forward_batched(x, adj, dice_hot, params))
    assert probs_b.shape == (B, nclass)

    # single-sample path (matches the torch forward signature)
    probs_0 = jax.block_until_ready(gcn_forward(x[0], adj[0], dice_hot[0], params))
    assert probs_0.shape == (nclass,)

    # pure-JAX reference check
    ref = jnp.stack([gcn_reference(x[i], adj[i], dice_hot[i], params) for i in range(B)])
    assert bool(jnp.isfinite(probs_b).all())
    assert bool(jnp.allclose(probs_b, ref, atol=5e-3, rtol=5e-3))
    assert bool(jnp.allclose(probs_0, ref[0], atol=5e-3, rtol=5e-3))
    assert bool(jnp.all(jnp.abs(jnp.sum(probs_b, axis=-1) - 1.0) < 2e-3))  # softmax sums to 1

    print("KERNEL_OK")
</pallas_src>

<mosaic_0001>
module attributes {stable_mosaic.version = 11 : i64} {
  func.func @_gcn_fused_kernel(%arg0: i32, %arg1: memref<1x8x8xf32, #tpu.memory_space<vmem>>, %arg2: memref<1x8x8xf32, #tpu.memory_space<vmem>>, %arg3: memref<1x1x6xf32, #tpu.memory_space<vmem>>, %arg4: memref<8x6xf32, #tpu.memory_space<vmem>>, %arg5: memref<1x6xf32, #tpu.memory_space<vmem>>, %arg6: memref<8x6x30xf32, #tpu.memory_space<vmem>>, %arg7: memref<6x30xf32, #tpu.memory_space<vmem>>, %arg8: memref<1x30xf32, #tpu.memory_space<vmem>>, %arg9: memref<30x4xf32, #tpu.memory_space<vmem>>, %arg10: memref<1x4xf32, #tpu.memory_space<vmem>>, %arg11: memref<1x1x4xf32, #tpu.memory_space<vmem>>) attributes {dimension_semantics = [#tpu.dimension_semantics<parallel>], iteration_bounds = array<i64: 4>, scalar_prefetch = 0 : i64, scratch_operands = 0 : i64, tpu.core_type = #tpu.core_type<tc>, window_params = [{transform_indices = @transform_0, window_bounds = array<i64: 1, 8, 8>}, {transform_indices = @transform_1, window_bounds = array<i64: 1, 8, 8>}, {transform_indices = @transform_2, window_bounds = array<i64: 1, 1, 6>}, {pipeline_mode = #tpu.pipeline_mode<synchronous>, transform_indices = @transform_3, window_bounds = array<i64: 8, 6>}, {pipeline_mode = #tpu.pipeline_mode<synchronous>, transform_indices = @transform_4, window_bounds = array<i64: 1, 6>}, {pipeline_mode = #tpu.pipeline_mode<synchronous>, transform_indices = @transform_5, window_bounds = array<i64: 8, 6, 30>}, {pipeline_mode = #tpu.pipeline_mode<synchronous>, transform_indices = @transform_6, window_bounds = array<i64: 6, 30>}, {pipeline_mode = #tpu.pipeline_mode<synchronous>, transform_indices = @transform_7, window_bounds = array<i64: 1, 30>}, {pipeline_mode = #tpu.pipeline_mode<synchronous>, transform_indices = @transform_8, window_bounds = array<i64: 30, 4>}, {pipeline_mode = #tpu.pipeline_mode<synchronous>, transform_indices = @transform_9, window_bounds = array<i64: 1, 4>}, {transform_indices = @transform_10, window_bounds = array<i64: 1, 1, 4>}]} {
    %c0 = arith.constant 0 : index
    %c0_0 = arith.constant 0 : index
    %c0_1 = arith.constant 0 : index
    %0 = vector.load %arg1[%c0, %c0_0, %c0_1] : memref<1x8x8xf32, #tpu.memory_space<vmem>>, vector<1x8x8xf32>
    %1 = vector.shape_cast %0 : vector<1x8x8xf32> to vector<8x8xf32>
    %c0_2 = arith.constant 0 : index
    %c0_3 = arith.constant 0 : index
    %c0_4 = arith.constant 0 : index
    %2 = vector.load %arg2[%c0_2, %c0_3, %c0_4] : memref<1x8x8xf32, #tpu.memory_space<vmem>>, vector<1x8x8xf32>
    %3 = vector.shape_cast %2 : vector<1x8x8xf32> to vector<8x8xf32>
    %c0_5 = arith.constant 0 : index
    %c0_6 = arith.constant 0 : index
    %c0_7 = arith.constant 0 : index
    %4 = vector.load %arg3[%c0_5, %c0_6, %c0_7] : memref<1x1x6xf32, #tpu.memory_space<vmem>>, vector<1x1x6xf32>
    %5 = vector.shape_cast %4 : vector<1x1x6xf32> to vector<1x6xf32>
    %c0_8 = arith.constant 0 : index
    %c0_9 = arith.constant 0 : index
    %6 = vector.load %arg4[%c0_8, %c0_9] : memref<8x6xf32, #tpu.memory_space<vmem>>, vector<8x6xf32>
    %cst = arith.constant dense<0.000000e+00> : vector<8x6xf32>
    %7 = tpu.matmul %1, %6, %cst {dimension_numbers = #tpu.dot_dimension_numbers<[1], [0], [0], [1], [0, 0, 1, 1], [], []>} : vector<8x8xf32>, vector<8x6xf32>, vector<8x6xf32> -> vector<8x6xf32>
    %cst_10 = arith.constant dense<0.000000e+00> : vector<8x6xf32>
    %8 = tpu.matmul %3, %7, %cst_10 {dimension_numbers = #tpu.dot_dimension_numbers<[1], [0], [0], [1], [0, 0, 1, 1], [], []>} : vector<8x8xf32>, vector<8x6xf32>, vector<8x6xf32> -> vector<8x6xf32>
    %c0_11 = arith.constant 0 : index
    %c0_12 = arith.constant 0 : index
    %9 = vector.load %arg5[%c0_11, %c0_12] : memref<1x6xf32, #tpu.memory_space<vmem>>, vector<1x6xf32>
    %10 = vector.broadcast %9 : vector<1x6xf32> to vector<8x6xf32>
    %11 = arith.addf %8, %10 : vector<8x6xf32>
    %cst_13 = arith.constant 0.000000e+00 : f32
    %12 = vector.broadcast %cst_13 : f32 to vector<8x6xf32>
    %13 = arith.maximumf %11, %12 : vector<8x6xf32>
    %c0_14 = arith.constant 0 : index
    %c0_15 = arith.constant 0 : index
    %14 = vector.load %arg7[%c0_14, %c0_15] : memref<6x30xf32, #tpu.memory_space<vmem>>, vector<6x30xf32>
    %cst_16 = arith.constant dense<0.000000e+00> : vector<1x30xf32>
    %15 = tpu.matmul %5, %14, %cst_16 {dimension_numbers = #tpu.dot_dimension_numbers<[1], [0], [0], [1], [0, 0, 1, 1], [], []>} : vector<1x6xf32>, vector<6x30xf32>, vector<1x30xf32> -> vector<1x30xf32>
    %16 = vector.extract_strided_slice %13 {offsets = [0, 0], sizes = [1, 6], strides = [1, 1]} : vector<8x6xf32> to vector<1x6xf32>
    %c0_17 = arith.constant 0 : index
    %c0_18 = arith.constant 0 : index
    %c0_19 = arith.constant 0 : index
    %17 = vector.load %arg6[%c0_17, %c0_18, %c0_19] : memref<8x6x30xf32, #tpu.memory_space<vmem>>, vector<1x6x30xf32>
    %18 = vector.shape_cast %17 : vector<1x6x30xf32> to vector<6x30xf32>
    %cst_20 = arith.constant dense<0.000000e+00> : vector<1x30xf32>
    %19 = tpu.matmul %16, %18, %cst_20 {dimension_numbers = #tpu.dot_dimension_numbers<[1], [0], [0], [1], [0, 0, 1, 1], [], []>} : vector<1x6xf32>, vector<6x30xf32>, vector<1x30xf32> -> vector<1x30xf32>
    %20 = arith.addf %15, %19 : vector<1x30xf32>
    %21 = vector.extract_strided_slice %13 {offsets = [1, 0], sizes = [1, 6], strides = [1, 1]} : vector<8x6xf32> to vector<1x6xf32>
    %c1 = arith.constant 1 : index
    %c0_21 = arith.constant 0 : index
    %c0_22 = arith.constant 0 : index
    %22 = vector.load %arg6[%c1, %c0_21, %c0_22] : memref<8x6x30xf32, #tpu.memory_space<vmem>>, vector<1x6x30xf32>
    %23 = vector.shape_cast %22 : vector<1x6x30xf32> to vector<6x30xf32>
    %cst_23 = arith.constant dense<0.000000e+00> : vector<1x30xf32>
    %24 = tpu.matmul %21, %23, %cst_23 {dimension_numbers = #tpu.dot_dimension_numbers<[1], [0], [0], [1], [0, 0, 1, 1], [], []>} : vector<1x6xf32>, vector<6x30xf32>, vector<1x30xf32> -> vector<1x30xf32>
    %25 = arith.addf %20, %24 : vector<1x30xf32>
    %26 = vector.extract_strided_slice %13 {offsets = [2, 0], sizes = [1, 6], strides = [1, 1]} : vector<8x6xf32> to vector<1x6xf32>
    %c2 = arith.constant 2 : index
    %c0_24 = arith.constant 0 : index
    %c0_25 = arith.constant 0 : index
    %27 = vector.load %arg6[%c2, %c0_24, %c0_25] : memref<8x6x30xf32, #tpu.memory_space<vmem>>, vector<1x6x30xf32>
    %28 = vector.shape_cast %27 : vector<1x6x30xf32> to vector<6x30xf32>
    %cst_26 = arith.constant dense<0.000000e+00> : vector<1x30xf32>
    %29 = tpu.matmul %26, %28, %cst_26 {dimension_numbers = #tpu.dot_dimension_numbers<[1], [0], [0], [1], [0, 0, 1, 1], [], []>} : vector<1x6xf32>, vector<6x30xf32>, vector<1x30xf32> -> vector<1x30xf32>
    %30 = arith.addf %25, %29 : vector<1x30xf32>
    %31 = vector.extract_strided_slice %13 {offsets = [3, 0], sizes = [1, 6], strides = [1, 1]} : vector<8x6xf32> to vector<1x6xf32>
    %c3 = arith.constant 3 : index
    %c0_27 = arith.constant 0 : index
    %c0_28 = arith.constant 0 : index
    %32 = vector.load %arg6[%c3, %c0_27, %c0_28] : memref<8x6x30xf32, #tpu.memory_space<vmem>>, vector<1x6x30xf32>
    %33 = vector.shape_cast %32 : vector<1x6x30xf32> to vector<6x30xf32>
    %cst_29 = arith.constant dense<0.000000e+00> : vector<1x30xf32>
    %34 = tpu.matmul %31, %33, %cst_29 {dimension_numbers = #tpu.dot_dimension_numbers<[1], [0], [0], [1], [0, 0, 1, 1], [], []>} : vector<1x6xf32>, vector<6x30xf32>, vector<1x30xf32> -> vector<1x30xf32>
    %35 = arith.addf %30, %34 : vector<1x30xf32>
    %36 = vector.extract_strided_slice %13 {offsets = [4, 0], sizes = [1, 6], strides = [1, 1]} : vector<8x6xf32> to vector<1x6xf32>
    %c4 = arith.constant 4 : index
    %c0_30 = arith.constant 0 : index
    %c0_31 = arith.constant 0 : index
    %37 = vector.load %arg6[%c4, %c0_30, %c0_31] : memref<8x6x30xf32, #tpu.memory_space<vmem>>, vector<1x6x30xf32>
    %38 = vector.shape_cast %37 : vector<1x6x30xf32> to vector<6x30xf32>
    %cst_32 = arith.constant dense<0.000000e+00> : vector<1x30xf32>
    %39 = tpu.matmul %36, %38, %cst_32 {dimension_numbers = #tpu.dot_dimension_numbers<[1], [0], [0], [1], [0, 0, 1, 1], [], []>} : vector<1x6xf32>, vector<6x30xf32>, vector<1x30xf32> -> vector<1x30xf32>
    %40 = arith.addf %35, %39 : vector<1x30xf32>
    %41 = vector.extract_strided_slice %13 {offsets = [5, 0], sizes = [1, 6], strides = [1, 1]} : vector<8x6xf32> to vector<1x6xf32>
    %c5 = arith.constant 5 : index
    %c0_33 = arith.constant 0 : index
    %c0_34 = arith.constant 0 : index
    %42 = vector.load %arg6[%c5, %c0_33, %c0_34] : memref<8x6x30xf32, #tpu.memory_space<vmem>>, vector<1x6x30xf32>
    %43 = vector.shape_cast %42 : vector<1x6x30xf32> to vector<6x30xf32>
    %cst_35 = arith.constant dense<0.000000e+00> : vector<1x30xf32>
    %44 = tpu.matmul %41, %43, %cst_35 {dimension_numbers = #tpu.dot_dimension_numbers<[1], [0], [0], [1], [0, 0, 1, 1], [], []>} : vector<1x6xf32>, vector<6x30xf32>, vector<1x30xf32> -> vector<1x30xf32>
    %45 = arith.addf %40, %44 : vector<1x30xf32>
    %46 = vector.extract_strided_slice %13 {offsets = [6, 0], sizes = [1, 6], strides = [1, 1]} : vector<8x6xf32> to vector<1x6xf32>
    %c6 = arith.constant 6 : index
    %c0_36 = arith.constant 0 : index
    %c0_37 = arith.constant 0 : index
    %47 = vector.load %arg6[%c6, %c0_36, %c0_37] : memref<8x6x30xf32, #tpu.memory_space<vmem>>, vector<1x6x30xf32>
    %48 = vector.shape_cast %47 : vector<1x6x30xf32> to vector<6x30xf32>
    %cst_38 = arith.constant dense<0.000000e+00> : vector<1x30xf32>
    %49 = tpu.matmul %46, %48, %cst_38 {dimension_numbers = #tpu.dot_dimension_numbers<[1], [0], [0], [1], [0, 0, 1, 1], [], []>} : vector<1x6xf32>, vector<6x30xf32>, vector<1x30xf32> -> vector<1x30xf32>
    %50 = arith.addf %45, %49 : vector<1x30xf32>
    %51 = vector.extract_strided_slice %13 {offsets = [7, 0], sizes = [1, 6], strides = [1, 1]} : vector<8x6xf32> to vector<1x6xf32>
    %c7 = arith.constant 7 : index
    %c0_39 = arith.constant 0 : index
    %c0_40 = arith.constant 0 : index
    %52 = vector.load %arg6[%c7, %c0_39, %c0_40] : memref<8x6x30xf32, #tpu.memory_space<vmem>>, vector<1x6x30xf32>
    %53 = vector.shape_cast %52 : vector<1x6x30xf32> to vector<6x30xf32>
    %cst_41 = arith.constant dense<0.000000e+00> : vector<1x30xf32>
    %54 = tpu.matmul %51, %53, %cst_41 {dimension_numbers = #tpu.dot_dimension_numbers<[1], [0], [0], [1], [0, 0, 1, 1], [], []>} : vector<1x6xf32>, vector<6x30xf32>, vector<1x30xf32> -> vector<1x30xf32>
    %55 = arith.addf %50, %54 : vector<1x30xf32>
    %c0_42 = arith.constant 0 : index
    %c0_43 = arith.constant 0 : index
    %56 = vector.load %arg8[%c0_42, %c0_43] : memref<1x30xf32, #tpu.memory_space<vmem>>, vector<1x30xf32>
    %57 = arith.addf %55, %56 : vector<1x30xf32>
    %cst_44 = arith.constant 0.000000e+00 : f32
    %58 = vector.broadcast %cst_44 : f32 to vector<1x30xf32>
    %59 = arith.maximumf %57, %58 : vector<1x30xf32>
    %c0_45 = arith.constant 0 : index
    %c0_46 = arith.constant 0 : index
    %60 = vector.load %arg9[%c0_45, %c0_46] : memref<30x4xf32, #tpu.memory_space<vmem>>, vector<30x4xf32>
    %cst_47 = arith.constant dense<0.000000e+00> : vector<1x4xf32>
    %61 = tpu.matmul %59, %60, %cst_47 {dimension_numbers = #tpu.dot_dimension_numbers<[1], [0], [0], [1], [0, 0, 1, 1], [], []>} : vector<1x30xf32>, vector<30x4xf32>, vector<1x4xf32> -> vector<1x4xf32>
    %c0_48 = arith.constant 0 : index
    %c0_49 = arith.constant 0 : index
    %62 = vector.load %arg10[%c0_48, %c0_49] : memref<1x4xf32, #tpu.memory_space<vmem>>, vector<1x4xf32>
    %63 = arith.addf %61, %62 : vector<1x4xf32>
    %cst_50 = arith.constant dense<0xFF800000> : vector<1xf32>
    %64 = vector.multi_reduction <maximumf>, %63, %cst_50 [1] : vector<1x4xf32> to vector<1xf32>
    %65 = vector.shape_cast %64 : vector<1xf32> to vector<1x1xf32>
    %66 = vector.broadcast %65 : vector<1x1xf32> to vector<1x4xf32>
    %67 = arith.subf %63, %66 : vector<1x4xf32>
    %68 = math.exp %67 : vector<1x4xf32>
    %cst_51 = arith.constant dense<0.000000e+00> : vector<1xf32>
    %69 = vector.multi_reduction <add>, %68, %cst_51 [1] : vector<1x4xf32> to vector<1xf32>
    %70 = vector.shape_cast %69 : vector<1xf32> to vector<1x1xf32>
    %71 = tpu.reciprocal %70 {approx = true} : vector<1x1xf32> -> vector<1x1xf32>
    %72 = vector.broadcast %71 : vector<1x1xf32> to vector<1x4xf32>
    %73 = arith.mulf %68, %72 : vector<1x4xf32>
    %c0_52 = arith.constant 0 : index
    %c0_53 = arith.constant 0 : index
    %c0_54 = arith.constant 0 : index
    %74 = vector.load %arg11[%c0_52, %c0_53, %c0_54] : memref<1x1x4xf32, #tpu.memory_space<vmem>>, vector<1x1x4xf32>
    %75 = vector.shape_cast %74 : vector<1x1x4xf32> to vector<1x4xf32>
    %76 = vector.shape_cast %73 : vector<1x4xf32> to vector<1x1x4xf32>
    tpu.vector_store %arg11[%c0_52, %c0_53, %c0_54], %76 {strides = array<i32>} : memref<1x1x4xf32, #tpu.memory_space<vmem>>, vector<1x1x4xf32>,
    return
  }
  func.func @transform_0(%arg0: i32) -> (i32, i32, i32) {
    %c0_i32 = arith.constant 0 : i32
    %c0_i32_0 = arith.constant 0 : i32
    %c0_i32_1 = arith.constant 0 : i32
    return %arg0, %c0_i32, %c0_i32_0 : i32, i32, i32
  }
  func.func @transform_1(%arg0: i32) -> (i32, i32, i32) {
    %c0_i32 = arith.constant 0 : i32
    %c0_i32_0 = arith.constant 0 : i32
    %c0_i32_1 = arith.constant 0 : i32
    return %arg0, %c0_i32, %c0_i32_0 : i32, i32, i32
  }
  func.func @transform_2(%arg0: i32) -> (i32, i32, i32) {
    %c0_i32 = arith.constant 0 : i32
    %c0_i32_0 = arith.constant 0 : i32
    %c0_i32_1 = arith.constant 0 : i32
    return %arg0, %c0_i32, %c0_i32_0 : i32, i32, i32
  }
  func.func @transform_3(%arg0: i32) -> (i32, i32) {
    %c0_i32 = arith.constant 0 : i32
    %c0_i32_0 = arith.constant 0 : i32
    %c0_i32_1 = arith.constant 0 : i32
    return %c0_i32, %c0_i32_0 : i32, i32
  }
  func.func @transform_4(%arg0: i32) -> (i32, i32) {
    %c0_i32 = arith.constant 0 : i32
    %c0_i32_0 = arith.constant 0 : i32
    %c0_i32_1 = arith.constant 0 : i32
    return %c0_i32, %c0_i32_0 : i32, i32
  }
  func.func @transform_5(%arg0: i32) -> (i32, i32, i32) {
    %c0_i32 = arith.constant 0 : i32
    %c0_i32_0 = arith.constant 0 : i32
    %c0_i32_1 = arith.constant 0 : i32
    %c0_i32_2 = arith.constant 0 : i32
    return %c0_i32, %c0_i32_0, %c0_i32_1 : i32, i32, i32
  }
  func.func @transform_6(%arg0: i32) -> (i32, i32) {
    %c0_i32 = arith.constant 0 : i32
    %c0_i32_0 = arith.constant 0 : i32
    %c0_i32_1 = arith.constant 0 : i32
    return %c0_i32, %c0_i32_0 : i32, i32
  }
  func.func @transform_7(%arg0: i32) -> (i32, i32) {
    %c0_i32 = arith.constant 0 : i32
    %c0_i32_0 = arith.constant 0 : i32
    %c0_i32_1 = arith.constant 0 : i32
    return %c0_i32, %c0_i32_0 : i32, i32
  }
  func.func @transform_8(%arg0: i32) -> (i32, i32) {
    %c0_i32 = arith.constant 0 : i32
    %c0_i32_0 = arith.constant 0 : i32
    %c0_i32_1 = arith.constant 0 : i32
    return %c0_i32, %c0_i32_0 : i32, i32
  }
  func.func @transform_9(%arg0: i32) -> (i32, i32) {
    %c0_i32 = arith.constant 0 : i32
    %c0_i32_0 = arith.constant 0 : i32
    %c0_i32_1 = arith.constant 0 : i32
    return %c0_i32, %c0_i32_0 : i32, i32
  }
  func.func @transform_10(%arg0: i32) -> (i32, i32, i32) {
    %c0_i32 = arith.constant 0 : i32
    %c0_i32_0 = arith.constant 0 : i32
    %c0_i32_1 = arith.constant 0 : i32
    return %arg0, %c0_i32, %c0_i32_0 : i32, i32, i32
  }
}

</mosaic_0001>

<bundles_post_ra>
// kernel: tpu_custom_call.1
= control target key start
LH: loop header
LB: loop body
LE: loop exit
PB: predicated region body
PF: predicated region fallthrough
CT: control target
= control target key end

     0   :  { %15 = vsyncpa [#allocation3], 0  ;;  %s1201_s0 = inlined_call_operand.vmem [shape: f32[4,8,8], index: 0, kind: input, shape index: {}]   ;;  %s1202_s1 = inlined_call_operand.vmem [shape: f32[4,8,8], index: 1, kind: input, shape index: {}]   ;;  %s1203_s2 = inlined_call_operand.vmem [shape: f32[4,1,6], index: 2, kind: input, shape index: {}]   ;;  %s1204_s3 = inlined_call_operand.vmem [shape: f32[8,6], index: 3, kind: input, shape index: {}]   ;;  %s1205_s4 = inlined_call_operand.vmem [shape: f32[1,6], index: 4, kind: input, shape index: {}]   ;;  %s1206_s5 = inlined_call_operand.vmem [shape: f32[8,6,30], index: 5, kind: input, shape index: {}]   ;;  %s1207_s6 = inlined_call_operand.vmem [shape: f32[6,30], index: 6, kind: input, shape index: {}]   ;;  %s1208_s7 = inlined_call_operand.vmem [shape: f32[1,30], index: 7, kind: input, shape index: {}]   ;;  %s1209_s8 = inlined_call_operand.vmem [shape: f32[30,4], index: 8, kind: input, shape index: {}]   ;;  %s1210_s9 = inlined_call_operand.vmem [shape: f32[1,4], index: 9, kind: input, shape index: {}]   ;;  %s1211_s10 = inlined_call_operand.hbm [shape: f32[4,1,4], index: 10, kind: output, shape index: {}]  }
   0x1   :  { %17 = vsyncpa [#allocation3 + $0x1], 0  ;;  %s1037_s13 = smov 0   ;;  %s1039_s14 = smov 0  }
   0x2   :  { %s1041_s15 = smov 0   ;;  %s1043_s16 = smov 0  }
   0x3 LB: > { %s1058_s17 = sadd.s32 4294967295, %s980_s16   ;;  %s837_s18 = sadd.s32 4294967294, %s980_s16   ;;  %s980_s16 = sphi %s1043_s16, %s1217_s16   ;;  %s976_s15 = sphi %s1041_s15, %s1216_s15   ;;  %s972_s14 = sphi %s1039_s14, %s1215_s14   ;;  %s968_s13 = sphi %s1037_s13, %s1214_s13  }
   0x4   : > { %s1062_s19 = sadd.s32 1, %s980_s16   ;;  %s255_s20 = sadd.s32 1, %s976_s15 }
   0x5   : > { %s252_s21 = ssub.s32 %s980_s16, %s1062_s19  ;;  %p265_p0 = scmp.ne.s32.totalorder %s976_s15, %s972_s14 }
   0x6   : > { %p253_p1 = scmp.eq.s32.totalorder %s252_s21, 0  ;;  %p266_p2 = scmp.eq.s32.totalorder %s1058_s17, 3 }
   0x7   : > { %p271_p3 = scmp.ne.s32.totalorder %s972_s14, %s968_s13  ;;  %p272_p4 = scmp.eq.s32.totalorder %s837_s18, 3 }
   0x8   : > { %s1073_s22 = scalar_select %p253_p1, %s976_s15, %s255_s20  }
   0x9   : > { %p1075_p5 = por %p266_p2, %p265_p0  ;;  %p1079_p6 = por %p272_p4, %p271_p3 }
   0xa   : > { %p840_p7 = scmp.ge.s32.totalorder %s980_s16, 1  ;;  %p331_p8 = scmp.lt.s32.totalorder %s980_s16, 5 }
   0xc   : > { %p332_p9 = pnand %p840_p7, %p331_p8 }
   0xd   : > { %p374_p10 = scmp.lt.s32.totalorder (!%p332_p9), %s1058_s17, 3  ;;  %s372_s26 = sand.u32 (!%p332_p9), 1, %s972_s14  }
   0xe   : > { %335 = sbr.rel (%p332_p9) target bundleno = 826 (0x33a), region = 60 }
  0x13   : > { %v388_v0 = vld [vmem:[%s1204_s3] sm:$0xff]  ;;  %s375_s27 = scalar_select %p374_p10, %s1058_s17, 3  ;;  %vm389_vm0 = vcmask 64512   ;;  %vm447_vm1 = vcmask 1045504   ;;  %vm443_vm2 = vcmask 48128   ;;  %v705_v26 = vld [vmem:[%s1209_s8 + $0x10] sm:$0xff] }
  0x14   : > { %408 = vmatpush.msra.mxu0 %v388_v0  ;;  %v441_v2 = vld [vmem:[%s1207_s6] sm:$0x3f]  ;;  %v855_v7 = vld [vmem:[%s1206_s5 + $0x18] sm:$0x3f]  ;;  %v849_v8 = vld [vmem:[%s1206_s5 + $0x8] sm:$0x3f] }
  0x15   : > { %s841_s28 = sshll.u32 %s375_s27, 3  ;;  %s384_s20 = scalar_lea.vmem %s1203_s2, %s375_s27  ;;  %847 = vmatpush.msk.msra.mxu3 %vm447_vm1, %v441_v2  ;;  %v442_v6 = vld [vmem:[%s1206_s5] sm:$0x3f]  ;;  %v852_v9 = vld [vmem:[%s1206_s5 + $0x10] sm:$0x3f]  ;;  %v704_v27 = vld [vmem:[%s1209_s8 + $0x8] sm:$0xff] }
  0x16   : > { %s377_s11 = scalar_lea.vmem %s1201_s0, %s841_s28  ;;  %v387_v3 = vld [vmem:[%s384_s20] sm:$0x1]  ;;  %s381_s30 = scalar_lea.vmem %s1202_s1, %s841_s28  ;;  %845 = vmatpush.msk.msra.mxu2 %vm447_vm1, %v442_v6  ;;  %850 = vmatpush.msk.msrb.mxu0 %vm447_vm1, %v849_v8  ;;  %v861_v11 = vld [vmem:[%s1206_s5 + $0x28] sm:$0x3f]  ;;  %v864_v12 = vld [vmem:[%s1206_s5 + $0x30] sm:$0x3f] }
  0x17   : > { %v385_v1 = vld [vmem:[%s377_s11] sm:$0xff]  ;;  %848 = vmatmul.msk.f32.vlgmr.msra.gmra.mxu3 %vm443_vm2, %v387_v3  ;;  %v867_v17 = vld [vmem:[%s1206_s5 + $0x38] sm:$0x3f]  ;;  %vm708_vm3 = vcmask 244736   ;;  %vm735_vm4 = vcmask 24576   ;;  %s757_s27 = scalar_lea.hbm %s1211_s10, %s1058_s17  ;;  %s373_s11 = scalar_lea.vmem [#allocation2], %s372_s26 }
  0x18   : > { %843 = vmatmul.msk.f32.vlgmr.msra.gmra.mxu0 %vm389_vm0, %v385_v1  ;;  %v386_v4 = vld [vmem:[%s381_s30] sm:$0xff]  ;;  %856 = vmatpush.msk.msrb.mxu2 %vm447_vm1, %v855_v7  ;;  %v706_v25 = vld [vmem:[%s1209_s8 + $0x18] sm:$0x3f]  ;;  %s759_s12 = sshll.u32 %s373_s11, 4  ;;  %s761_s18 = sshll.u32 %s757_s27, 4  ;;  %s760_s12 = int_to_ptr.vmem [resolvable:$true] %s759_s12  ;;  %s762_s18 = int_to_ptr.hbm [resolvable:$true] %s761_s18 }
  0x19   : > { %v858_v10 = vld [vmem:[%s1206_s5 + $0x20] sm:$0x3f]  ;;  %862 = vmatpush.msk.msra.mxu0 %vm447_vm1, %v861_v11  ;;  %s749_s20 = scalar_lea.sflag [#allocation3], %s372_s26  ;;  %s932_s21 = sshra.s32 %s762_s18, 4  ;;  %s933_s21 = int_to_ptr.hbm [resolvable:$true] %s932_s21 }
  0x1a   : > { %859 = vmatpush.msk.msrb.mxu3 %vm447_vm1, %v858_v10  ;;  %v913_v13 = vld [vmem:[%s1205_s4] ss:$0 sm:$0xff]  ;;  %s934_s25 = scalar_lea.hbm %s933_s21, 1  ;;  %s938_s17 = scalar_lea.hbm %s1211_s10, 4 }
  0x1b   : > { %v703_v28 = vld [vmem:[%s1209_s8] sm:$0xff]  ;;  %p935_p11 = scmp.ne.s32.totalorder %s933_s21, %s934_s25  ;;  %p939_p0 = scmp.lt.s32.totalorder %s933_s21, %s1211_s10 }
  0x1c   : > { %870 = vmatpush.msk.msra.mxu3 %vm447_vm1, %v706_v25  ;;  %v700_v45 = vld [vmem:[%s1208_s7] sm:$0x1]  ;;  %p940_p1 = scmp.lt.s32.totalorder %s938_s17, %s934_s25 }
  0x1d   : > { %v707_v49 = vld [vmem:[%s1210_s9] sm:$0x1]  ;;  %p936_p12 = pnand %p935_p11, %p1075_p5 }
  0x1e   : > { %728 = vmatpush.msra.mxu3 %v705_v26  ;;  %p941_p2 = por %p940_p1, %p939_p0 }
  0x1f   : > { %p937_p13 = pneg %p936_p12 }
  0x20   : > { %729 = vmatpush.msra.mxu3 %v704_v27 }
  0x21   : > { %p942_p3 = pnand %p941_p2, %p937_p13 }
  0x22   : > { %730 = vmatpush.msra.mxu3 %v703_v28 }
  0x95   : > { %v410_v5 = vpop.f32.mrf.mxu0 }
  0x96   : > { %435 = vmatpush.msra.mxu1 %v410_v5 }
  0x97   : > { %844 = vmatmul.msk.f32.vlgmr.msra.gmra.mxu1 %vm389_vm0, %v386_v4 }
  0x98   : > { %853 = vmatpush.msk.msrb.mxu1 %vm447_vm1, %v852_v9 }
  0x9a   : > { %865 = vmatpush.msk.msra.mxu1 %vm447_vm1, %v864_v12  ;;  %v494_v29 = vpop.f32.mrf.mxu3 }
 0x114   : > { %v437_v14 = vpop.f32.mrf.mxu1 }
 0x115   : > { %v438_v15 = vadd.f32 %v913_v13, %v437_v14 }
 0x117   : > { %v440_v16 = vmax.f32 %v438_v15, 0.0 }
 0x119   : > { %846 = vmatmul.msk.f32.vlgmr.msra.gmra.mxu2 %vm443_vm2, %v440_v16  ;;  %v499_v18 = vrot.slane %v440_v16, 1  ;;  %v528_v19 = vrot.slane %v440_v16, 2  ;;  %v586_v20 = vrot.slane %v440_v16, 4  ;;  %v557_v21 = vrot.slane %v440_v16, 3 }
 0x11a   : > { %868 = vmatpush.msk.msra.mxu2 %vm447_vm1, %v867_v17  ;;  %v615_v22 = vrot.slane %v440_v16, 5  ;;  %v644_v23 = vrot.slane %v440_v16, 6  ;;  %v673_v24 = vrot.slane %v440_v16, 7 }
 0x11b   : > { %851 = vmatmul.msk.f32.vlgmr.msrb.gmra.mxu0 %vm443_vm2, %v499_v18  ;;  %854 = vmatmul.msk.f32.vlgmr.msrb.gmra.mxu1 %vm443_vm2, %v528_v19 }
 0x11c   : > { %860 = vmatmul.msk.f32.vlgmr.msrb.gmra.mxu3 %vm443_vm2, %v586_v20 }
 0x121   : > { %857 = vmatmul.msk.f32.vlgmr.msrb.gmra.mxu2 %vm443_vm2, %v557_v21 }
 0x123   : > { %863 = vmatmul.msk.f32.vlgmr.msra.gmra.mxu0 %vm443_vm2, %v615_v22  ;;  %866 = vmatmul.msk.f32.vlgmr.msra.gmra.mxu1 %vm443_vm2, %v644_v23 }
 0x129   : > { %869 = vmatmul.msk.f32.vlgmr.msra.gmra.mxu2 %vm443_vm2, %v673_v24 }
 0x198   : > { %v522_v32 = vpop.f32.mrf.mxu0  ;;  %v551_v34 = vpop.f32.mrf.mxu1 }
 0x19c   : > { %v468_v30 = vpop.f32.mrf.mxu2 }
 0x19d   : > { %v495_v31 = vadd.f32 %v494_v29, %v468_v30 }
 0x19f   : > { %v525_v33 = vadd.f32 %v522_v32, %v495_v31  ;;  %v609_v38 = vpop.f32.mrf.mxu3 }
 0x1a0   : > { %v638_v40 = vpop.f32.mrf.mxu0  ;;  %v667_v42 = vpop.f32.mrf.mxu1 }
 0x1a1   : > { %v554_v35 = vadd.f32 %v551_v34, %v525_v33 }
 0x1a4   : > { %v580_v36 = vpop.f32.mrf.mxu2 }
 0x1a5   : > { %v583_v37 = vadd.f32 %v580_v36, %v554_v35 }
 0x1a7   : > { %v612_v39 = vadd.f32 %v609_v38, %v583_v37 }
 0x1a9   : > { %v641_v41 = vadd.f32 %v638_v40, %v612_v39 }
 0x1ab   : > { %v670_v43 = vadd.f32 %v667_v42, %v641_v41 }
 0x1ac   : > { %v696_v44 = vpop.f32.mrf.mxu2 }
 0x1ad   : > { %v699_v46 = vadd.f32 %v696_v44, %v670_v43 }
 0x1af   : > { %v701_v47 = vadd.f32 %v700_v45, %v699_v46 }
 0x1b1   : > { %v702_v48 = vmax.f32 %v701_v47, 0.0 }
 0x1b3   : > { %871 = vmatmul.msk.f32.vlgmr.msra.gmra.mxu3 %vm708_vm3, %v702_v48 }
 0x236   : > { %v732_v50 = vpop.f32.mrf.mxu3 }
 0x237   : > { %v733_v51 = vadd.f32 %v732_v50, %v707_v49 }
 0x239   : > { %v736_v52 = vsel %vm735_vm4, %v733_v51, -inf }
 0x23a   : > { %737 = vmax.xlane.f32.xlu0 %v736_v52 }
 0x2ad   : > { %v738_v53 = vpop.xlane.xlu0 %737 }
 0x2ae   : > { %v739_v54 = vsub.f32 %v733_v51, %v738_v53 }
 0x2b0   : > { %v740_v55 = vmul.f32 1.442695, %v739_v54 }
 0x2b2   : > { %914 = vpow2.f32 %v740_v55 }
 0x2b8   : > { %v915_v56 = vpop.eup %914 }
 0x2b9   : > { %v742_v57 = vsel %vm735_vm4, %v915_v56, 0.0 }
 0x2ba   : > { %743 = vadd.xlane.f32.xlu0 %v742_v57 }
 0x32d   : > { %v744_v58 = vpop.xlane.xlu0 %743 }
 0x32e   : > { %916 = vrcp.f32 %v744_v58 }
 0x334   : > { %v917_v59 = vpop.eup %916 }
 0x335   : > { %v746_v60 = vmul.f32 %v917_v59, %v915_v56 }
 0x337   : > { %747 = vst.msk [vmem:[%s373_s11] sm:$0x1] %vm735_vm4, %v746_v60 }
 0x338   : > { %945 = shalt.err (!%p942_p3)
}
 0x339   : > { %874 = dma.vmem_to_hbm [thread:$0]  (%p1075_p5), %s760_s12, 16, %s762_s18, %s749_s20  }
 0x33a PF: > { %p880_p4 = scmp.ge.s32.totalorder %s980_s16, 2  ;;  %s773_s26 = sand.u32 1, %s968_s13  }
 0x33b   : > { %s774_s11 = scalar_lea.sflag [#allocation3], %s773_s26 }
 0x33c   : > { %p877_p7 = pnand %p880_p4, %p1079_p6 }
 0x33e   : > { %p878_p8 = pneg %p877_p7 }
 0x340   : > { %963 = dma.done.wait (%p878_p8), %s774_s11, 16  }
 0x341   : > { %965 = vsyncadd (%p878_p8), %s774_s11, 4294967280  ;;  %p20_p9 = scmp.ge.s32.totalorder %s1062_s19, 6   ;;  %s1214_s13 = smov %s972_s14 }
 0x342   : > { %s1215_s14 = smov %s976_s15  ;;  %s1216_s15 = smov %s1073_s22 }
 0x343   : > { %s1217_s16 = smov %s1062_s19  ;;  %22 = sbr.rel (!%p20_p9) target bundleno = 3 (0x3), region = 108 }
 0x348   :  { %779 = vsyncpa [#allocation3], 1 }
 0x349   :  { %781 = vsyncpa [#allocation3 + $0x1], 1 }

</bundles_post_ra>
